<compile_context>
chip_gen: v5e
topology: v5e:2x2
jax: 0.10.0
libtpu: 0.0.40
codegen_flags: <defaults>
</compile_context>

<pallas_src>
import functools

import jax
import jax.numpy as jnp
from jax import lax
from jax.experimental import pallas as pl
from jax.experimental.pallas import tpu as pltpu


def _channel_attention_kernel(x_ref, w1_ref, b1_ref, w2_ref, b2_ref, o_ref,
                              *, hw_true, hw_pad):
    # x_ref block: (Nb, C, HWp) -- channels on sublanes, flattened spatial on lanes.
    nb = x_ref.shape[0]
    inv_hw = 1.0 / hw_true

    x = x_ref[...]
    xf = x.astype(jnp.float32)                                   # f32 accumulation for pooling

    # Global average pooling (zero-padding does not affect the sum; divide by true HW).
    avg = jnp.sum(xf, axis=-1) * inv_hw                          # (Nb, C)

    # Global max pooling; mask pad lanes with -inf only when padding was added.
    if hw_pad != hw_true:
        lane = lax.broadcasted_iota(jnp.int32, xf.shape, 2)
        xm = jnp.where(lane < hw_true, xf, -jnp.inf)
    else:
        xm = xf
    mx = jnp.max(xm, axis=-1)                                    # (Nb, C)

    # Batched squeeze-excite MLP: avg rows stacked above max rows -> one matmul pair per step.
    pooled = jnp.concatenate([avg, mx], axis=0)                  # (2*Nb, C)
    h = jnp.dot(pooled, w1_ref[...],
                preferred_element_type=jnp.float32) + b1_ref[...]          # (2*Nb, Cr)
    h = jnp.maximum(h, 0.0)                                      # ReLU
    y = jnp.dot(h, w2_ref[...],
                preferred_element_type=jnp.float32) + b2_ref[...]          # (2*Nb, C)

    # avg_out + max_out (each already carries its own +b2), then sigmoid.
    scale = jax.nn.sigmoid(y[:nb] + y[nb:])                      # (Nb, C)

    # One broadcast multiply + one lane-dense store for the whole block.
    o_ref[...] = (xf * scale[:, :, None]).astype(o_ref.dtype)


def _pick_block_n(n, per_image_bytes, target_bytes=4 << 20):
    """Largest divisor Nb of n with Nb * per_image_bytes <= target_bytes (>=1)."""
    best = 1
    for nb in range(1, n + 1):
        if n % nb:
            continue
        if nb * per_image_bytes > target_bytes:
            break
        best = nb
    return best


def channel_attention(x_nchw, w1t, b1, w2t, b2, *, donate_input=False):
    """x_nchw: (N, C, H, W).  w1t: (Cr, C) [= fc1.weight squeezed], b1: (Cr,),
    w2t: (C, Cr) [= fc2.weight squeezed], b2: (C,).  Returns (N, C, H, W)."""
    N, C, H, W = x_nchw.shape
    Cr = w1t.shape[0]
    HW = H * W
    itemsize = jnp.dtype(x_nchw.dtype).itemsize

    # Free contiguous reshape -- no transpose; channels stay on sublanes, spatial on lanes.
    x_nc_hw = x_nchw.reshape(N, C, HW)

    # Keep the big store lane-dense: pad the flattened spatial axis to a multiple of 128.
    HWp = ((HW + 127) // 128) * 128
    if HWp != HW:
        x_nc_hw = jnp.pad(x_nc_hw, ((0, 0), (0, 0), (0, HWp - HW)))

    # Weights oriented so the kernel does (2*Nb, C) @ (C, Cr) and (2*Nb, Cr) @ (Cr, C)
    # with no in-kernel transposes; biases as broadcastable row vectors.
    w1m = w1t.T.astype(jnp.float32)                 # (C, Cr)
    w2m = w2t.T.astype(jnp.float32)                 # (Cr, C)
    b1r = b1.reshape(1, Cr).astype(jnp.float32)
    b2r = b2.reshape(1, C).astype(jnp.float32)

    nb = _pick_block_n(N, C * HWp * itemsize)
    grid = (N // nb,)
    block_bytes = nb * C * HWp * itemsize

    # VMEM budget: double-buffered input + output blocks + weights + slack, with headroom
    # well below v7x's 64 MiB physical VMEM.
    vmem_limit = int(min(48 << 20, max(32 << 20, 4 * block_bytes + (2 << 20))))

    cost = pl.CostEstimate(
        flops=3 * N * C * HW + 8 * N * C * Cr,      # pooling + scale-mul dominate; MLP is tiny
        transcendentals=N * C,                      # sigmoid
        bytes_accessed=(2 * N * C * HWp * itemsize
                        + 4 * (2 * C * Cr + C + Cr)),
    )

    kernel = functools.partial(_channel_attention_kernel, hw_true=HW, hw_pad=HWp)

    out_nc_hw = pl.pallas_call(
        kernel,
        out_shape=jax.ShapeDtypeStruct((N, C, HWp), x_nc_hw.dtype),
        grid_spec=pltpu.PrefetchScalarGridSpec(
            num_scalar_prefetch=0,
            grid=grid,
            in_specs=[
                pl.BlockSpec((nb, C, HWp), lambda n: (n, 0, 0)),
                pl.BlockSpec((C, Cr), lambda n: (0, 0)),
                pl.BlockSpec((1, Cr), lambda n: (0, 0)),
                pl.BlockSpec((Cr, C), lambda n: (0, 0)),
                pl.BlockSpec((1, C), lambda n: (0, 0)),
            ],
            out_specs=pl.BlockSpec((nb, C, HWp), lambda n: (n, 0, 0)),
        ),
        compiler_params=pltpu.CompilerParams(
            dimension_semantics=("parallel",),
            vmem_limit_bytes=vmem_limit,
        ),
        cost_estimate=cost,
        input_output_aliases=({0: 0} if donate_input else {}),
    )(x_nc_hw, w1m, b1r, w2m, b2r)

    if HWp != HW:
        out_nc_hw = out_nc_hw[:, :, :HW]
    return out_nc_hw.reshape(N, C, H, W)


def _reference(x_nchw, w1t, b1, w2t, b2):
    """Pure-JAX reference matching the PyTorch forward (1x1 convs == dense over C)."""
    avg = jnp.mean(x_nchw, axis=(2, 3))                          # (N, C)
    mx = jnp.max(x_nchw, axis=(2, 3))                            # (N, C)

    def mlp(p):
        h = jnp.maximum(p @ w1t.T + b1, 0.0)
        return h @ w2t.T + b2

    scale = jax.nn.sigmoid(mlp(avg) + mlp(mx))                   # (N, C)
    return x_nchw * scale[:, :, None, None]


if __name__ == "__main__":
    # Module shapes: channel=32, reduction=16 -> hidden Cr = 2
    N, C, H, W = 2, 32, 16, 16
    reduction = 16
    Cr = C // reduction

    key = jax.random.PRNGKey(0)
    kx, k1, k2, k3, k4 = jax.random.split(key, 5)

    x = jax.random.normal(kx, (N, C, H, W), dtype=jnp.float32)

    # Conv2d 1x1 weights in their native (squeezed) layout:
    #   fc1.weight (Cr, C, 1, 1) -> w1t (Cr, C);  fc2.weight (C, Cr, 1, 1) -> w2t (C, Cr).
    w1t = jax.random.normal(k1, (Cr, C), dtype=jnp.float32) * (1.0 / jnp.sqrt(C))
    b1 = jax.random.normal(k2, (Cr,), dtype=jnp.float32) * 0.1
    w2t = jax.random.normal(k3, (C, Cr), dtype=jnp.float32) * (1.0 / jnp.sqrt(Cr))
    b2 = jax.random.normal(k4, (C,), dtype=jnp.float32) * 0.1

    out = channel_attention(x, w1t, b1, w2t, b2)
    out = jax.block_until_ready(out)

    ref = _reference(x, w1t, b1, w2t, b2)
    assert out.shape == (N, C, H, W)
    assert jnp.allclose(out, ref, atol=1e-5, rtol=1e-5), "mismatch vs reference"

    print("KERNEL_OK")
</pallas_src>

<mosaic_0001>
module attributes {stable_mosaic.version = 11 : i64} {
  func.func @_channel_attention_kernel(%arg0: i32, %arg1: memref<2x32x256xf32, #tpu.memory_space<vmem>>, %arg2: memref<32x2xf32, #tpu.memory_space<vmem>>, %arg3: memref<1x2xf32, #tpu.memory_space<vmem>>, %arg4: memref<2x32xf32, #tpu.memory_space<vmem>>, %arg5: memref<1x32xf32, #tpu.memory_space<vmem>>, %arg6: memref<2x32x256xf32, #tpu.memory_space<vmem>>) attributes {dimension_semantics = [#tpu.dimension_semantics<parallel>], iteration_bounds = array<i64: 1>, scalar_prefetch = 0 : i64, scratch_operands = 0 : i64, tpu.core_type = #tpu.core_type<tc>, window_params = [{transform_indices = @transform_0, window_bounds = array<i64: 2, 32, 256>}, {pipeline_mode = #tpu.pipeline_mode<synchronous>, transform_indices = @transform_1, window_bounds = array<i64: 32, 2>}, {pipeline_mode = #tpu.pipeline_mode<synchronous>, transform_indices = @transform_2, window_bounds = array<i64: 1, 2>}, {pipeline_mode = #tpu.pipeline_mode<synchronous>, transform_indices = @transform_3, window_bounds = array<i64: 2, 32>}, {pipeline_mode = #tpu.pipeline_mode<synchronous>, transform_indices = @transform_4, window_bounds = array<i64: 1, 32>}, {transform_indices = @transform_5, window_bounds = array<i64: 2, 32, 256>}]} {
    %c0 = arith.constant 0 : index
    %c0_0 = arith.constant 0 : index
    %c0_1 = arith.constant 0 : index
    %0 = vector.load %arg1[%c0, %c0_0, %c0_1] : memref<2x32x256xf32, #tpu.memory_space<vmem>>, vector<2x32x256xf32>
    %cst = arith.constant dense<0.000000e+00> : vector<2x32xf32>
    %1 = vector.multi_reduction <add>, %0, %cst [2] : vector<2x32x256xf32> to vector<2x32xf32>
    %cst_2 = arith.constant 3.906250e-03 : f32
    %2 = vector.broadcast %cst_2 : f32 to vector<2x32xf32>
    %3 = arith.mulf %1, %2 : vector<2x32xf32>
    %cst_3 = arith.constant dense<0xFF800000> : vector<2x32xf32>
    %4 = vector.multi_reduction <maximumf>, %0, %cst_3 [2] : vector<2x32x256xf32> to vector<2x32xf32>
    %5 = tpu.concatenate %3, %4 in 0 : vector<2x32xf32>, vector<2x32xf32> -> vector<4x32xf32>
    %c0_4 = arith.constant 0 : index
    %c0_5 = arith.constant 0 : index
    %6 = vector.load %arg2[%c0_4, %c0_5] : memref<32x2xf32, #tpu.memory_space<vmem>>, vector<32x2xf32>
    %cst_6 = arith.constant dense<0.000000e+00> : vector<4x2xf32>
    %7 = tpu.matmul %5, %6, %cst_6 {dimension_numbers = #tpu.dot_dimension_numbers<[1], [0], [0], [1], [0, 0, 1, 1], [], []>} : vector<4x32xf32>, vector<32x2xf32>, vector<4x2xf32> -> vector<4x2xf32>
    %c0_7 = arith.constant 0 : index
    %c0_8 = arith.constant 0 : index
    %8 = vector.load %arg3[%c0_7, %c0_8] : memref<1x2xf32, #tpu.memory_space<vmem>>, vector<1x2xf32>
    %9 = vector.broadcast %8 : vector<1x2xf32> to vector<4x2xf32>
    %10 = arith.addf %7, %9 : vector<4x2xf32>
    %cst_9 = arith.constant 0.000000e+00 : f32
    %11 = vector.broadcast %cst_9 : f32 to vector<4x2xf32>
    %12 = arith.maximumf %10, %11 : vector<4x2xf32>
    %c0_10 = arith.constant 0 : index
    %c0_11 = arith.constant 0 : index
    %13 = vector.load %arg4[%c0_10, %c0_11] : memref<2x32xf32, #tpu.memory_space<vmem>>, vector<2x32xf32>
    %cst_12 = arith.constant dense<0.000000e+00> : vector<4x32xf32>
    %14 = tpu.matmul %12, %13, %cst_12 {dimension_numbers = #tpu.dot_dimension_numbers<[1], [0], [0], [1], [0, 0, 1, 1], [], []>} : vector<4x2xf32>, vector<2x32xf32>, vector<4x32xf32> -> vector<4x32xf32>
    %c0_13 = arith.constant 0 : index
    %c0_14 = arith.constant 0 : index
    %15 = vector.load %arg5[%c0_13, %c0_14] : memref<1x32xf32, #tpu.memory_space<vmem>>, vector<1x32xf32>
    %16 = vector.broadcast %15 : vector<1x32xf32> to vector<4x32xf32>
    %17 = arith.addf %14, %16 : vector<4x32xf32>
    %18 = vector.extract_strided_slice %17 {offsets = [0, 0], sizes = [2, 32], strides = [1, 1]} : vector<4x32xf32> to vector<2x32xf32>
    %19 = vector.extract_strided_slice %17 {offsets = [2, 0], sizes = [2, 32], strides = [1, 1]} : vector<4x32xf32> to vector<2x32xf32>
    %20 = arith.addf %18, %19 : vector<2x32xf32>
    %21 = arith.negf %20 : vector<2x32xf32>
    %22 = math.exp %21 : vector<2x32xf32>
    %cst_15 = arith.constant 1.000000e+00 : f32
    %23 = vector.broadcast %cst_15 : f32 to vector<2x32xf32>
    %24 = arith.addf %23, %22 : vector<2x32xf32>
    %25 = arith.divf %23, %24 : vector<2x32xf32>
    %26 = vector.shape_cast %25 : vector<2x32xf32> to vector<2x32x1xf32>
    %27 = vector.broadcast %26 : vector<2x32x1xf32> to vector<2x32x256xf32>
    %28 = arith.mulf %0, %27 : vector<2x32x256xf32>
    %c0_16 = arith.constant 0 : index
    %c0_17 = arith.constant 0 : index
    %c0_18 = arith.constant 0 : index
    %29 = vector.load %arg6[%c0_16, %c0_17, %c0_18] : memref<2x32x256xf32, #tpu.memory_space<vmem>>, vector<2x32x256xf32>
    tpu.vector_store %arg6[%c0_16, %c0_17, %c0_18], %28 {strides = array<i32>} : memref<2x32x256xf32, #tpu.memory_space<vmem>>, vector<2x32x256xf32>,
    return
  }
  func.func @transform_0(%arg0: i32) -> (i32, i32, i32) {
    %c0_i32 = arith.constant 0 : i32
    %c0_i32_0 = arith.constant 0 : i32
    %c0_i32_1 = arith.constant 0 : i32
    return %arg0, %c0_i32, %c0_i32_0 : i32, i32, i32
  }
  func.func @transform_1(%arg0: i32) -> (i32, i32) {
    %c0_i32 = arith.constant 0 : i32
    %c0_i32_0 = arith.constant 0 : i32
    %c0_i32_1 = arith.constant 0 : i32
    return %c0_i32, %c0_i32_0 : i32, i32
  }
  func.func @transform_2(%arg0: i32) -> (i32, i32) {
    %c0_i32 = arith.constant 0 : i32
    %c0_i32_0 = arith.constant 0 : i32
    %c0_i32_1 = arith.constant 0 : i32
    return %c0_i32, %c0_i32_0 : i32, i32
  }
  func.func @transform_3(%arg0: i32) -> (i32, i32) {
    %c0_i32 = arith.constant 0 : i32
    %c0_i32_0 = arith.constant 0 : i32
    %c0_i32_1 = arith.constant 0 : i32
    return %c0_i32, %c0_i32_0 : i32, i32
  }
  func.func @transform_4(%arg0: i32) -> (i32, i32) {
    %c0_i32 = arith.constant 0 : i32
    %c0_i32_0 = arith.constant 0 : i32
    %c0_i32_1 = arith.constant 0 : i32
    return %c0_i32, %c0_i32_0 : i32, i32
  }
  func.func @transform_5(%arg0: i32) -> (i32, i32, i32) {
    %c0_i32 = arith.constant 0 : i32
    %c0_i32_0 = arith.constant 0 : i32
    %c0_i32_1 = arith.constant 0 : i32
    return %arg0, %c0_i32, %c0_i32_0 : i32, i32, i32
  }
}

</mosaic_0001>

<bundles_post_ra>
// kernel: tpu_custom_call.1
= control target key start
LH: loop header
LB: loop body
LE: loop exit
PB: predicated region body
PF: predicated region fallthrough
CT: control target
= control target key end

     0   :  { %10 = vsyncpa [#allocation3], 0  ;;  %s593_s0 = inlined_call_operand.hbm [shape: f32[2,32,256], index: 0, kind: input, shape index: {}]   ;;  %s594_s1 = inlined_call_operand.vmem [shape: f32[32,2], index: 1, kind: input, shape index: {}]   ;;  %s595_s2 = inlined_call_operand.vmem [shape: f32[1,2], index: 2, kind: input, shape index: {}]   ;;  %s596_s3 = inlined_call_operand.vmem [shape: f32[2,32], index: 3, kind: input, shape index: {}]   ;;  %s597_s4 = inlined_call_operand.vmem [shape: f32[1,32], index: 4, kind: input, shape index: {}]   ;;  %s598_s5 = inlined_call_operand.hbm [shape: f32[2,32,256], index: 5, kind: output, shape index: {}]  }
   0x1   :  { %11 = vsyncpa [#allocation4], 0  ;;  %s16_s20 = sshll.u32 %s593_s0, 4  ;;  %s432_s21 = smov [#allocation2]   ;;  %s17_s20 = int_to_ptr.hbm [resolvable:$true] %s16_s20 }
   0x2   :  { %s18_s22 = sshll.u32 %s432_s21, 4  ;;  %s433_s23 = smov 256   ;;  %s19_s22 = int_to_ptr.vmem [resolvable:$true] %s18_s22 }
   0x3   :  { %s434_s24 = smov 16  }
   0x4   :  { %24 = dma.hbm_to_vmem [thread:$0]  %s17_s20, 2048, %s19_s22, [#allocation3], %s433_s23, %s433_s23, %s434_s24  }
   0x5   :  { %428 = dma.done.wait [#allocation3], 2048  }
   0x6   :  { %429 = vsyncadd [#allocation3], 4294965248  ;;  %v472_v0 = vld [vmem:[#allocation2 + $0x40] sm:$0xff]  ;;  %v474_v1 = vld [vmem:[#allocation2 + $0x48] sm:$0xff]  ;;  %v117_v45 = vlaneseq  ;;  %vm122_vm0 = vcmask 130112   ;;  %vm126_vm1 = vcmask 195712  }
   0x7   :  { %v476_v2 = vld [vmem:[#allocation2] sm:$0xff]  ;;  %v65_v3 = vadd.f32 %v474_v1, %v472_v0  ;;  %v480_v4 = vld [vmem:[#allocation2 + $0x8] sm:$0xff]  ;;  %v490_v9 = vld [vmem:[#allocation2 + $0x50] sm:$0xff]  ;;  %v97_v25 = vmax.f32 %v472_v0, %v474_v1  ;;  %vm130_vm2 = vcmask 261312   ;;  %vm139_vm3 = vcmask 1041409   ;;  %s345_s13 = sshll.u32 %s598_s5, 4  ;;  %s346_s13 = int_to_ptr.hbm [resolvable:$true] %s345_s13 }
   0x8   :  { %v482_v5 = vld [vmem:[#allocation2 + $0x20] sm:$0xff]  ;;  %v484_v6 = vld [vmem:[#allocation2 + $0x28] sm:$0xff]  ;;  %v53_v7 = vadd.f32 %v480_v4, %v476_v2  ;;  %v492_v10 = vld [vmem:[#allocation2 + $0x58] sm:$0xff]  ;;  %v85_v24 = vmax.f32 %v476_v2, %v480_v4  ;;  %v118_v49 = vand.u32 127, %v117_v45  ;;  %vm164_vm4 = vcmask 1043459  }
   0x9   :  { %v59_v8 = vadd.f32 %v484_v6, %v482_v5  ;;  %66 = vadd.xlane.f32.xlu1 %v65_v3  ;;  %v494_v11 = vld [vmem:[#allocation2 + $0x10] sm:$0xff]  ;;  %v496_v12 = vld [vmem:[#allocation2 + $0x18] sm:$0xff]  ;;  %v498_v13 = vld [vmem:[#allocation2 + $0x60] sm:$0xff]  ;;  %v68_v15 = vadd.f32 %v492_v10, %v490_v9  ;;  %v100_v27 = vmax.f32 %v490_v9, %v492_v10  ;;  %v91_v29 = vmax.f32 %v482_v5, %v484_v6 }
   0xa   :  { %54 = vadd.xlane.f32.xlu0 %v53_v7  ;;  %v500_v14 = vld [vmem:[#allocation2 + $0x68] sm:$0xff]  ;;  %v56_v16 = vadd.f32 %v496_v12, %v494_v11  ;;  %v508_v18 = vld [vmem:[#allocation2 + $0x70] sm:$0xff]  ;;  %v510_v19 = vld [vmem:[#allocation2 + $0x78] sm:$0xff]  ;;  %v88_v26 = vmax.f32 %v494_v11, %v496_v12  ;;  %v120_v51 = vadd.s32 4294967288, %v118_v49  ;;  %v124_v55 = vadd.s32 4294967280, %v118_v49 }
   0xb   :  { %60 = vadd.xlane.f32.xlu2 %v59_v8  ;;  %v71_v17 = vadd.f32 %v500_v14, %v498_v13  ;;  %v512_v20 = vld [vmem:[#allocation2 + $0x30] sm:$0xff]  ;;  %v514_v21 = vld [vmem:[#allocation2 + $0x38] sm:$0xff]  ;;  %v74_v22 = vadd.f32 %v510_v19, %v508_v18  ;;  %v103_v28 = vmax.f32 %v498_v13, %v500_v14  ;;  %v106_v31 = vmax.f32 %v508_v18, %v510_v19  ;;  %v170_v40 = vld [vmem:[%s594_s1 + $0x8] sm:$0xff] }
   0xc   :  { %v62_v23 = vadd.f32 %v514_v21, %v512_v20  ;;  %v94_v30 = vmax.f32 %v512_v20, %v514_v21  ;;  %v172_v35 = vld [vmem:[%s594_s1 + $0x18] sm:$0xff]  ;;  %v171_v39 = vld [vmem:[%s594_s1 + $0x10] sm:$0xff]  ;;  %v169_v41 = vld [vmem:[%s594_s1] sm:$0xff]  ;;  %v128_v59 = vadd.s32 4294967272, %v118_v49  ;;  %vm167_vm5 = vcmask 1041408  }
   0xd   :  { %193 = vmatpush.msra.mxu0 %v172_v35  ;;  %vm177_vm6 = vcmask 261120   ;;  %vm207_vm7 = vcmask 15360  }
   0xf   :  { %194 = vmatpush.msra.mxu0 %v171_v39 }
  0x11   :  { %69 = vadd.xlane.f32.xlu1 %v68_v15  ;;  %195 = vmatpush.msra.mxu0 %v170_v40 }
  0x12   :  { %57 = vadd.xlane.f32.xlu0 %v56_v16 }
  0x13   :  { %72 = vadd.xlane.f32.xlu2 %v71_v17  ;;  %196 = vmatpush.msra.mxu0 %v169_v41 }
  0x19   :  { %75 = vadd.xlane.f32.xlu1 %v74_v22 }
  0x1a   :  { %63 = vadd.xlane.f32.xlu0 %v62_v23 }
  0x1b   :  { %86 = vmax.xlane.f32.xlu2 %v85_v24 }
  0x21   :  { %98 = vmax.xlane.f32.xlu1 %v97_v25 }
  0x22   :  { %89 = vmax.xlane.f32.xlu0 %v88_v26 }
  0x23   :  { %101 = vmax.xlane.f32.xlu2 %v100_v27 }
  0x29   :  { %104 = vmax.xlane.f32.xlu1 %v103_v28 }
  0x2a   :  { %92 = vmax.xlane.f32.xlu0 %v91_v29 }
  0x2b   :  { %95 = vmax.xlane.f32.xlu2 %v94_v30 }
  0x32   :  { %107 = vmax.xlane.f32.xlu0 %v106_v31 }
  0x7c   :  { %v67_v32 = vpop.xlane.xlu1 %66 }
  0x7d   :  { %v55_v33 = vpop.xlane.xlu0 %54  ;;  %v81_v50 = vmul.f32 0.00390625, %v67_v32 }
  0x7e   :  { %v61_v34 = vpop.xlane.xlu2 %60  ;;  %v77_v54 = vmul.f32 0.00390625, %v55_v33 }
  0x7f   :  { %v132_v56 = vperm.slane %v81_v50, %v118_v49  ;;  %v79_v57 = vmul.f32 0.00390625, %v61_v34  ;;  %v374_v50 = vld [vmem:[%s595_s2] ss:$0 sm:$0xff]  ;;  %s435_s2 = smov [#allocation5]  }
  0x80   :  { %v119_v7 = vperm.slane %v77_v54, %v118_v49  ;;  %v259_v54 = vshrl.u32 %v117_v45, 7 }
  0x81   :  { %v125_v23 = vperm.slane %v79_v57, %v124_v55  ;;  %v375_v57 = vld [vmem:[%s597_s4] ss:$0 sm:$0xff] }
  0x82   :  { %366 = vset.pattern.permute.xlu1 %v259_v54 }
  0x84   :  { %v70_v36 = vpop.xlane.xlu1 %69 }
  0x85   :  { %v58_v37 = vpop.xlane.xlu0 %57  ;;  %v82_v52 = vmul.f32 0.00390625, %v70_v36 }
  0x86   :  { %v73_v38 = vpop.xlane.xlu2 %72  ;;  %v78_v53 = vmul.f32 0.00390625, %v58_v37 }
  0x87   :  { %v83_v58 = vmul.f32 0.00390625, %v73_v38  ;;  %v133_v61 = vperm.slane %v82_v52, %v120_v51 }
  0x88   :  { %v121_v62 = vperm.slane %v78_v53, %v120_v51 }
  0x89   :  { %v135_v24 = vperm.slane %v83_v58, %v124_v55  ;;  %v134_v27 = vsel %vm122_vm0, %v133_v61, %v132_v56  ;;  %v266_v56 = vadd.s32 8, %v259_v54 }
  0x8a   :  { %v123_v28 = vsel %vm122_vm0, %v121_v62, %v119_v7 }
  0x8b   :  { %v136_v35 = vsel %vm126_vm1, %v135_v24, %v134_v27  ;;  %v127_v38 = vsel %vm126_vm1, %v125_v23, %v123_v28  ;;  %367 = vset.pattern.permute.xlu2 %v266_v56  ;;  %v278_v27 = vadd.s32 24, %v259_v54 }
  0x8c   :  { %v76_v42 = vpop.xlane.xlu1 %75 }
  0x8d   :  { %v64_v43 = vpop.xlane.xlu0 %63  ;;  %v84_v63 = vmul.f32 0.00390625, %v76_v42 }
  0x8e   :  { %v87_v44 = vpop.xlane.xlu2 %86  ;;  %v80_v3 = vmul.f32 0.00390625, %v64_v43 }
  0x8f   :  { %v150_v8 = vperm.slane %v87_v44, %v118_v49  ;;  %v137_v29 = vperm.slane %v84_v63, %v128_v59 }
  0x90   :  { %v129_v30 = vperm.slane %v80_v3, %v128_v59 }
  0x91   :  { %v138_v41 = vsel %vm130_vm2, %v137_v29, %v136_v35 }
  0x92   :  { %v131_v40 = vsel %vm130_vm2, %v129_v30, %v127_v38 }
  0x94   :  { %v99_v47 = vpop.xlane.xlu1 %98 }
  0x95   :  { %v90_v46 = vpop.xlane.xlu0 %89  ;;  %v157_v15 = vperm.slane %v99_v47, %v118_v49  ;;  %v202_v49 = vld [vmem:[%s596_s3] sm:$0x3]  ;;  %s343_s3 = sshll.u32 %s435_s2, 4  ;;  %s344_s3 = int_to_ptr.vmem [resolvable:$true] %s343_s3 }
  0x96   :  { %v102_v48 = vpop.xlane.xlu2 %101  ;;  %v151_v16 = vperm.slane %v90_v46, %v120_v51  ;;  %v140_v46 = vsel %vm139_vm3, %v138_v41, %v131_v40  ;;  %359 = vmatpush.msk.msra.mxu1 %vm167_vm5, %v202_v49 }
  0x97   :  { %v158_v17 = vperm.slane %v102_v48, %v120_v51 }
  0x98   :  { %v152_v32 = vsel %vm122_vm0, %v151_v16, %v150_v8 }
  0x99   :  { %v159_v33 = vsel %vm122_vm0, %v158_v17, %v157_v15 }
  0x9c   :  { %v105_v22 = vpop.xlane.xlu1 %104 }
  0x9d   :  { %v93_v60 = vpop.xlane.xlu0 %92  ;;  %v160_v31 = vperm.slane %v105_v22, %v124_v55 }
  0x9e   :  { %v153_v25 = vperm.slane %v93_v60, %v124_v55  ;;  %v96_v26 = vpop.xlane.xlu2 %95  ;;  %v272_v55 = vadd.s32 16, %v259_v54 }
  0x9f   :  { %v155_v34 = vperm.slane %v96_v26, %v128_v59  ;;  %v161_v42 = vsel %vm126_vm1, %v160_v31, %v159_v33 }
  0xa0   :  { %v154_v36 = vsel %vm126_vm1, %v153_v25, %v152_v32  ;;  %368 = vset.pattern.permute.xlu0 %v272_v55 }
  0xa1   :  { %v156_v43 = vsel %vm130_vm2, %v155_v34, %v154_v36 }
  0xa5   :  { %v108_v37 = vpop.xlane.xlu0 %107 }
  0xa6   :  { %v162_v39 = vperm.slane %v108_v37, %v128_v59 }
  0xa8   :  { %v163_v44 = vsel %vm130_vm2, %v162_v39, %v161_v42 }
  0xa9   :  { %v165_v47 = vsel %vm164_vm4, %v163_v44, %v156_v43 }
  0xaa   :  { %v168_v48 = vsel %vm167_vm5, %v140_v46, %v165_v47 }
  0xab   :  { %358 = vmatmul.msk.f32.vlgmr.msra.gmra.mxu0 %vm177_vm6, %v168_v48 }
 0x128   :  { %v198_v51 = vpop.f32.mrf.mxu0 }
 0x129   :  { %v199_v52 = vadd.f32 %v374_v50, %v198_v51 }
 0x12b   :  { %v201_v53 = vmax.f32 %v199_v52, 0.0 }
 0x12d   :  { %360 = vmatmul.msk.f32.vlgmr.msra.gmra.mxu1 %vm207_vm7, %v201_v53 }
 0x1aa   :  { %v231_v58 = vpop.f32.mrf.mxu1 }
 0x1ab   :  { %v232_v59 = vadd.f32 %v375_v57, %v231_v58 }
 0x1ad   :  { %v235_v60 = vrot.slane %v232_v59, 2 }
 0x1af   :  { %v237_v61 = vadd.f32 %v235_v60, %v232_v59 }
 0x1b1   :  { %v361_v62 = vmul.f32 -1.442695, %v237_v61 }
 0x1b3   :  { %376 = vpow2.f32 %v361_v62 }
 0x1b9   :  { %v377_v63 = vpop.eup %376 }
 0x1ba   :  { %v241_v3 = vadd.f32 1.0, %v377_v63 }
 0x1bc   :  { %378 = vrcp.f32 %v241_v3  ;;  %v253_v15 = vand.u32 2147483648, %v241_v3  ;;  %v251_v17 = vand.u32 2147483647, %v241_v3  ;;  %vm247_vm9 = vweird.f32 %v241_v3 }
 0x1be   :  { %v254_v23 = vor.u32 1.1754944e-38, %v253_v15  ;;  %vm252_vm11 = vcmp.eq.f32.partialorder %v251_v17, 8.507059e+37 }
 0x1c2   :  { %v379_v7 = vpop.eup %378 }
 0x1c3   :  { %v243_v45 = vmul.f32 %v379_v7, %v241_v3  ;;  %vm248_vm8 = vweird.f32 %v379_v7 }
 0x1c4   :  { %vm249_vm10 = vmor %vm247_vm9, %vm248_vm8 }
 0x1c5   :  { %v244_v8 = vsub.f32 1.0, %v243_v45 }
 0x1c7   :  { %v245_v16 = vmul.f32 %v379_v7, %v244_v8 }
 0x1c9   :  { %v246_v22 = vadd.f32 %v379_v7, %v245_v16 }
 0x1cb   :  { %v250_v24 = vsel %vm249_vm10, %v379_v7, %v246_v22 }
 0x1cc   :  { %v255_v25 = vsel %vm252_vm11, %v254_v23, %v250_v24 }
 0x1cd   :  { %v257_v26 = vperm.slane %v255_v25, 0  ;;  %v282_v28 = vperm.slane %v255_v25, 1 }
 0x1cf   :  { %274 = vperm.xlu0 %368, %v257_v26   ;;  %268 = vperm.xlu2 %367, %v257_v26  }
 0x1d0   :  { %262 = vperm.xlu1 %366, %v257_v26  }
 0x1d7   :  { %369 = vset.pattern.permute.xlu2 %v278_v27  ;;  %373 = vset.pattern.permute.xlu0 %v278_v27 }
 0x1d8   :  { %287 = vperm.xlu1 %366, %v282_v28  }
 0x1df   :  { %280 = vperm.xlu2 %369, %v257_v26  }
 0x1e0   :  { %371 = vset.pattern.permute.xlu1 %v272_v55 }
 0x1e7   :  { %370 = vset.pattern.permute.xlu2 %v266_v56 }
 0x1e8   :  { %299 = vperm.xlu1 %371, %v282_v28  }
 0x1ef   :  { %293 = vperm.xlu2 %370, %v282_v28  }
 0x1f7   :  { %372 = vset.pattern.permute.xlu2 %v278_v27 }
 0x1ff   :  { %305 = vperm.xlu2 %372, %v282_v28  }
 0x229   :  { %v269_v29 = vpop.permute.xlu2 %268 }
 0x22a   :  { %v309_v30 = vmul.f32 %v269_v29, %v494_v11  ;;  %v310_v31 = vmul.f32 %v269_v29, %v496_v12 }
 0x22c   :  { %325 = vst [vmem:[#allocation5 + $0x10] sm:$0xff] %v309_v30 }
 0x22d   :  { %326 = vst [vmem:[#allocation5 + $0x18] sm:$0xff] %v310_v31 }
 0x239   :  { %v281_v32 = vpop.permute.xlu2 %280 }
 0x23a   :  { %v313_v33 = vmul.f32 %v281_v32, %v512_v20  ;;  %v314_v34 = vmul.f32 %v281_v32, %v514_v21 }
 0x23c   :  { %329 = vst [vmem:[#allocation5 + $0x30] sm:$0xff] %v313_v33 }
 0x23d   :  { %330 = vst [vmem:[#allocation5 + $0x38] sm:$0xff] %v314_v34 }
 0x241   :  { %v275_v35 = vpop.permute.xlu0 %274 }
 0x242   :  { %v311_v36 = vmul.f32 %v275_v35, %v482_v5  ;;  %v312_v37 = vmul.f32 %v275_v35, %v484_v6  ;;  %v263_v38 = vpop.permute.xlu1 %262 }
 0x243   :  { %v307_v39 = vmul.f32 %v263_v38, %v476_v2  ;;  %v308_v11 = vmul.f32 %v263_v38, %v480_v4 }
 0x244   :  { %327 = vst [vmem:[#allocation5 + $0x20] sm:$0xff] %v311_v36 }
 0x245   :  { %328 = vst [vmem:[#allocation5 + $0x28] sm:$0xff] %v312_v37 }
 0x246   :  { %323 = vst [vmem:[#allocation5] sm:$0xff] %v307_v39 }
 0x247   :  { %324 = vst [vmem:[#allocation5 + $0x8] sm:$0xff] %v308_v11 }
 0x249   :  { %v294_v12 = vpop.permute.xlu2 %293 }
 0x24a   :  { %v317_v20 = vmul.f32 %v294_v12, %v490_v9  ;;  %v318_v21 = vmul.f32 %v294_v12, %v492_v10  ;;  %v288_v40 = vpop.permute.xlu1 %287 }
 0x24b   :  { %v315_v41 = vmul.f32 %v288_v40, %v472_v0  ;;  %v316_v5 = vmul.f32 %v288_v40, %v474_v1 }
 0x24c   :  { %333 = vst [vmem:[#allocation5 + $0x50] sm:$0xff] %v317_v20 }
 0x24d   :  { %334 = vst [vmem:[#allocation5 + $0x58] sm:$0xff] %v318_v21 }
 0x24e   :  { %331 = vst [vmem:[#allocation5 + $0x40] sm:$0xff] %v315_v41 }
 0x24f   :  { %332 = vst [vmem:[#allocation5 + $0x48] sm:$0xff] %v316_v5 }
 0x259   :  { %v306_v2 = vpop.permute.xlu2 %305 }
 0x25a   :  { %v321_v4 = vmul.f32 %v306_v2, %v508_v18  ;;  %v322_v6 = vmul.f32 %v306_v2, %v510_v19  ;;  %v300_v42 = vpop.permute.xlu1 %299 }
 0x25b   :  { %v319_v0 = vmul.f32 %v300_v42, %v498_v13  ;;  %v320_v1 = vmul.f32 %v300_v42, %v500_v14 }
 0x25c   :  { %337 = vst [vmem:[#allocation5 + $0x70] sm:$0xff] %v321_v4 }
 0x25d   :  { %338 = vst [vmem:[#allocation5 + $0x78] sm:$0xff] %v322_v6 }
 0x25e   :  { %335 = vst [vmem:[#allocation5 + $0x60] sm:$0xff] %v319_v0 }
 0x25f   :  { %336 = vst [vmem:[#allocation5 + $0x68] sm:$0xff] %v320_v1 }
 0x260   :  { %351 = dma.vmem_to_hbm [thread:$0]  %s344_s3, 2048, %s346_s13, [#allocation4], %s433_s23, %s433_s23, %s434_s24  }
 0x261   :  { %430 = dma.done.wait [#allocation4], 2048  }
 0x262   :  { %431 = vsyncadd [#allocation4], 4294965248 }
 0x263   :  { %356 = vsyncpa [#allocation3], 1 }
 0x264   :  { %357 = vsyncpa [#allocation4], 1 }

</bundles_post_ra>
